<compile_context>
chip_gen: v5e
topology: v5e:2x2
jax: 0.10.0
libtpu: 0.0.40
codegen_flags: <defaults>
</compile_context>

<pallas_src>
import functools

import jax
import jax.numpy as jnp
from jax import lax
from jax.experimental import pallas as pl
from jax.experimental.pallas import tpu as pltpu

_LANES = 128
_MAX_BLOCK_ROWS = 1024   # (1024, 128) f32 = 512 KiB per buffer


def _i32(v):
    """Hex constant -> int32 (two's complement)."""
    v &= 0xFFFFFFFF
    return jnp.int32(v - (1 << 32) if v >= (1 << 31) else v)


def _lsr(x, k):
    """Logical right shift on int32 (plain >> is arithmetic for signed)."""
    return (x >> k) & jnp.int32((1 << (32 - k)) - 1)


def _keep_from_hash(idx, seed, p):
    """Counter-based Bernoulli(keep = 1 - p) decision from (flat index, seed).

    lowbias32 / murmur3-style finalizer written entirely in wrapping int32
    mul / xor / shift so it lowers identically on the TPU VPU and in interpret
    mode, and is bitwise reproducible across timesteps and tile sizes.
    Shared by the kernel and the host-side reference (mask_array).
    """
    h = idx * _i32(0x9E3779B9) + seed * _i32(0x85EBCA6B)
    h = h ^ _lsr(h, 16)
    h = h * _i32(0x7FEB352D)
    h = h ^ _lsr(h, 15)
    h = h * _i32(0x846CA68B)
    h = h ^ _lsr(h, 16)
    r24 = _lsr(h, 8)                                   # uniform over [0, 2^24)
    thr = jnp.int32(int(round(p * float(1 << 24))))
    return r24 >= thr                                  # keep with prob (1 - p)


# ---------------------------------------------------------------------------
# Fused kernel: regenerate the frozen mask from the seed and apply dropout.
# Used for both the first timestep and every reapply timestep.
# ---------------------------------------------------------------------------
def _dropout_kernel(seed_ref, x_ref, y_ref, *, p):
    rows, lanes = x_ref.shape                          # = block shape
    base = pl.program_id(0) * (rows * lanes)           # flat slab offset of tile
    row = lax.broadcasted_iota(jnp.int32, (rows, lanes), 0)
    col = lax.broadcasted_iota(jnp.int32, (rows, lanes), 1)
    idx = base + row * lanes + col                     # flat element index
    keep = _keep_from_hash(idx, seed_ref[0], p)

    scale = jnp.float32(1.0 / (1.0 - p))
    x32 = x_ref[...].astype(jnp.float32)               # widen in-register
    y = jnp.where(keep, x32 * scale, jnp.float32(0.0))
    y_ref[...] = y.astype(y_ref.dtype)


def _dropout_slab(x_slab, seed, p):
    rows, lanes = x_slab.shape
    br = min(_MAX_BLOCK_ROWS, rows)                    # big lane-dense tile
    grid = (pl.cdiv(rows, br),)
    kernel = functools.partial(_dropout_kernel, p=float(p))
    return pl.pallas_call(
        kernel,
        out_shape=jax.ShapeDtypeStruct(x_slab.shape, x_slab.dtype),
        grid=grid,
        in_specs=[
            pl.BlockSpec(memory_space=pltpu.MemorySpace.SMEM),   # seed scalar
            pl.BlockSpec((br, lanes), lambda i: (i, 0)),         # x tile
        ],
        out_specs=pl.BlockSpec((br, lanes), lambda i: (i, 0)),   # y tile
        compiler_params=pltpu.CompilerParams(
            dimension_semantics=("parallel",)),        # megacore sharding on v7x
    )(jnp.asarray([seed], dtype=jnp.int32), x_slab)


# ---------------------------------------------------------------------------
# Stateful module wrapper (mirrors SpikingFlow Dropout semantics).
# ---------------------------------------------------------------------------
class Dropout:
    """SNN dropout: the keep-mask is frozen for a whole run until reset()."""

    def __init__(self, p=0.5):
        assert 0 < p < 1
        self.p = float(p)
        self.training = True
        # The mask is implicit in (seed, flat index); it is never stored.
        self.mask = None
        self._seed = None          # per-run state (None == mask not decided yet)

    def __call__(self, x, seed=0):
        if not self.training:
            return x
        if self._seed is None:     # first timestep of this run: freeze the seed
            self._seed = int(seed)

        n = x.size
        if n % _LANES == 0:
            # zero-copy path: contiguous reshape to a lane-dense slab
            slab = x.reshape(n // _LANES, _LANES)
            y = _dropout_slab(slab, self._seed, self.p)
            return y.reshape(x.shape)

        # ragged tail: pad the flat copy up to a lane multiple
        pad = (-n) % _LANES
        slab = jnp.pad(x.reshape(-1), (0, pad)).reshape(-1, _LANES)
        y = _dropout_slab(slab, self._seed, self.p)
        return y.reshape(-1)[:n].reshape(x.shape)

    def mask_array(self, shape):
        """Materialise the current run's mask (inspection / testing only)."""
        assert self._seed is not None, "no mask decided yet"
        n = 1
        for d in shape:
            n *= d
        n_pad = (-(-n // _LANES)) * _LANES
        idx = jnp.arange(n_pad, dtype=jnp.int32)
        keep = _keep_from_hash(idx, jnp.int32(self._seed), self.p)
        return keep[:n].astype(jnp.float32).reshape(shape)

    def reset(self):
        self._seed = None
        self.mask = None


if __name__ == "__main__":
    x1 = jax.random.normal(jax.random.PRNGKey(0), (2, 4, 16, 16), dtype=jnp.float32)
    x2 = jax.random.normal(jax.random.PRNGKey(1), (2, 4, 16, 16), dtype=jnp.float32)

    drop = Dropout(p=0.5)

    # timestep 0: mask decided from (seed, element index) inside the kernel
    y1 = jax.block_until_ready(drop(x1, seed=42))
    # timestep 1: the SAME mask must be applied (no mask tensor stored anywhere)
    y2 = jax.block_until_ready(drop(x2))

    mask = drop.mask_array(x1.shape)
    assert bool(jnp.all((mask == 0.0) | (mask == 1.0))), "mask is not binary"
    ref1 = mask * x1 / (1.0 - drop.p)
    ref2 = mask * x2 / (1.0 - drop.p)
    assert jnp.allclose(y1, ref1, atol=1e-6), "timestep-0 dropout mismatch"
    assert jnp.allclose(y2, ref2, atol=1e-6), "frozen-mask dropout mismatch"

    # the realized drop rate should be in the right ballpark for p=0.5
    drop_rate = float(1.0 - mask.mean())
    assert 0.3 < drop_rate < 0.7, f"suspicious drop rate {drop_rate}"

    # bf16 input keeps its dtype and reuses the same frozen mask
    x1_bf = x1.astype(jnp.bfloat16)
    y1_bf = jax.block_until_ready(drop(x1_bf))
    assert y1_bf.dtype == jnp.bfloat16
    ref_bf = (mask * x1_bf.astype(jnp.float32) / (1.0 - drop.p)).astype(jnp.bfloat16)
    assert jnp.allclose(y1_bf.astype(jnp.float32), ref_bf.astype(jnp.float32),
                        atol=1e-6), "bf16 dropout mismatch"

    # eval path: identity
    drop.training = False
    y_eval = jax.block_until_ready(drop(x1))
    assert jnp.allclose(y_eval, x1)

    # reset clears the run state so the next run draws a fresh mask
    drop.training = True
    drop.reset()
    assert drop._seed is None and drop.mask is None

    print("KERNEL_OK")
</pallas_src>

<mosaic_0001>
module attributes {stable_mosaic.version = 11 : i64} {
  func.func @_dropout_kernel(%arg0: i32, %arg1: memref<1xi32, #tpu.memory_space<smem>>, %arg2: memref<16x128xf32, #tpu.memory_space<vmem>>, %arg3: memref<16x128xf32, #tpu.memory_space<vmem>>) attributes {dimension_semantics = [#tpu.dimension_semantics<parallel>], iteration_bounds = array<i64: 1>, scalar_prefetch = 0 : i64, scratch_operands = 0 : i64, tpu.core_type = #tpu.core_type<tc>, window_params = [{transform_indices = @transform_0, window_bounds = array<i64: 1>}, {transform_indices = @transform_1, window_bounds = array<i64: 16, 128>}, {transform_indices = @transform_2, window_bounds = array<i64: 16, 128>}]} {
    %c2048_i32 = arith.constant 2048 : i32
    %0 = arith.muli %arg0, %c2048_i32 : i32
    %1 = tpu.iota {dimensions = array<i32: 0>} : vector<16x128xi32>
    %2 = tpu.iota {dimensions = array<i32: 1>} : vector<16x128xi32>
    %c128_i32 = arith.constant 128 : i32
    %3 = vector.broadcast %c128_i32 : i32 to vector<16x128xi32>
    %4 = arith.muli %1, %3 : vector<16x128xi32>
    %5 = vector.broadcast %0 : i32 to vector<16x128xi32>
    %6 = arith.addi %5, %4 : vector<16x128xi32>
    %7 = arith.addi %6, %2 : vector<16x128xi32>
    %c0 = arith.constant 0 : index
    %8 = memref.load %arg1[%c0] : memref<1xi32, #tpu.memory_space<smem>>
    %c-1640531527_i32 = arith.constant -1640531527 : i32
    %9 = vector.broadcast %c-1640531527_i32 : i32 to vector<16x128xi32>
    %10 = arith.muli %7, %9 : vector<16x128xi32>
    %c-2048144789_i32 = arith.constant -2048144789 : i32
    %11 = arith.muli %8, %c-2048144789_i32 : i32
    %12 = vector.broadcast %11 : i32 to vector<16x128xi32>
    %13 = arith.addi %10, %12 : vector<16x128xi32>
    %c16_i32 = arith.constant 16 : i32
    %14 = vector.broadcast %c16_i32 : i32 to vector<16x128xi32>
    %15 = arith.shrsi %13, %14 : vector<16x128xi32>
    %c65535_i32 = arith.constant 65535 : i32
    %16 = vector.broadcast %c65535_i32 : i32 to vector<16x128xi32>
    %17 = arith.andi %15, %16 : vector<16x128xi32>
    %18 = arith.xori %13, %17 : vector<16x128xi32>
    %c2146121005_i32 = arith.constant 2146121005 : i32
    %19 = vector.broadcast %c2146121005_i32 : i32 to vector<16x128xi32>
    %20 = arith.muli %18, %19 : vector<16x128xi32>
    %c15_i32 = arith.constant 15 : i32
    %21 = vector.broadcast %c15_i32 : i32 to vector<16x128xi32>
    %22 = arith.shrsi %20, %21 : vector<16x128xi32>
    %c131071_i32 = arith.constant 131071 : i32
    %23 = vector.broadcast %c131071_i32 : i32 to vector<16x128xi32>
    %24 = arith.andi %22, %23 : vector<16x128xi32>
    %25 = arith.xori %20, %24 : vector<16x128xi32>
    %c-2073254261_i32 = arith.constant -2073254261 : i32
    %26 = vector.broadcast %c-2073254261_i32 : i32 to vector<16x128xi32>
    %27 = arith.muli %25, %26 : vector<16x128xi32>
    %c16_i32_0 = arith.constant 16 : i32
    %28 = vector.broadcast %c16_i32_0 : i32 to vector<16x128xi32>
    %29 = arith.shrsi %27, %28 : vector<16x128xi32>
    %c65535_i32_1 = arith.constant 65535 : i32
    %30 = vector.broadcast %c65535_i32_1 : i32 to vector<16x128xi32>
    %31 = arith.andi %29, %30 : vector<16x128xi32>
    %32 = arith.xori %27, %31 : vector<16x128xi32>
    %c8_i32 = arith.constant 8 : i32
    %33 = vector.broadcast %c8_i32 : i32 to vector<16x128xi32>
    %34 = arith.shrsi %32, %33 : vector<16x128xi32>
    %c16777215_i32 = arith.constant 16777215 : i32
    %35 = vector.broadcast %c16777215_i32 : i32 to vector<16x128xi32>
    %36 = arith.andi %34, %35 : vector<16x128xi32>
    %c8388608_i32 = arith.constant 8388608 : i32
    %37 = vector.broadcast %c8388608_i32 : i32 to vector<16x128xi32>
    %38 = arith.cmpi sge, %36, %37 : vector<16x128xi32>
    %c0_2 = arith.constant 0 : index
    %c0_3 = arith.constant 0 : index
    %39 = vector.load %arg2[%c0_2, %c0_3] : memref<16x128xf32, #tpu.memory_space<vmem>>, vector<16x128xf32>
    %cst = arith.constant 2.000000e+00 : f32
    %40 = vector.broadcast %cst : f32 to vector<16x128xf32>
    %41 = arith.mulf %39, %40 : vector<16x128xf32>
    %cst_4 = arith.constant 0.000000e+00 : f32
    %42 = vector.broadcast %cst_4 : f32 to vector<16x128xf32>
    %43 = arith.select %38, %41, %42 : vector<16x128xi1>, vector<16x128xf32>
    %c0_5 = arith.constant 0 : index
    %c0_6 = arith.constant 0 : index
    %44 = vector.load %arg3[%c0_5, %c0_6] : memref<16x128xf32, #tpu.memory_space<vmem>>, vector<16x128xf32>
    tpu.vector_store %arg3[%c0_5, %c0_6], %43 {strides = array<i32>} : memref<16x128xf32, #tpu.memory_space<vmem>>, vector<16x128xf32>,
    return
  }
  func.func @transform_0(%arg0: i32) -> i32 {
    %c0_i32 = arith.constant 0 : i32
    %c0_i32_0 = arith.constant 0 : i32
    return %c0_i32 : i32
  }
  func.func @transform_1(%arg0: i32) -> (i32, i32) {
    %c0_i32 = arith.constant 0 : i32
    %c0_i32_0 = arith.constant 0 : i32
    return %arg0, %c0_i32 : i32, i32
  }
  func.func @transform_2(%arg0: i32) -> (i32, i32) {
    %c0_i32 = arith.constant 0 : i32
    %c0_i32_0 = arith.constant 0 : i32
    return %arg0, %c0_i32 : i32, i32
  }
}

</mosaic_0001>

<bundles_post_ra>
// kernel: tpu_custom_call.1
= control target key start
LH: loop header
LB: loop body
LE: loop exit
PB: predicated region body
PF: predicated region fallthrough
CT: control target
= control target key end

     0   :  { %8 = vsyncpa [#allocation4], 0  ;;  %s202_s0 = inlined_call_operand.<no memory space> [shape: s32[1], index: 0, kind: input, shape index: {}]   ;;  %s203_s1 = inlined_call_operand.hbm [shape: f32[16,128], index: 1, kind: input, shape index: {}]   ;;  %s204_s2 = inlined_call_operand.hbm [shape: f32[16,128], index: 2, kind: output, shape index: {}]  }
   0x1   :  { %9 = vsyncpa [#allocation5], 0  ;;  %s16_s11 = sshll.u32 %s203_s1, 4  ;;  %s168_s12 = smov [#allocation3]   ;;  %s17_s11 = int_to_ptr.hbm [resolvable:$true] %s16_s11 }
   0x2   :  { %s18_s13 = sshll.u32 %s168_s12, 4  ;;  %s169_s14 = smov 128   ;;  %s19_s13 = int_to_ptr.vmem [resolvable:$true] %s18_s13 }
   0x3   :  { %s170_s15 = smov 8  }
   0x4   :  { %24 = dma.hbm_to_vmem [thread:$0]  %s17_s11, 256, %s19_s13, [#allocation4], %s169_s14, %s169_s14, %s170_s15  }
   0x5   :  { %164 = dma.done.wait [#allocation4], 256  }
   0x6   :  { %165 = vsyncadd [#allocation4], 4294967040  ;;  %v30_v0 = vlaneseq  ;;  %s45_s18 = smul.u32 2246822507, %s202_s0  ;;  %v77_v25 = vld [vmem:[#allocation3] sm:$0xff]  ;;  %v78_v29 = vld [vmem:[#allocation3 + $0x8] sm:$0xff] }
   0x7   :  { %v79_v30 = vmul.f32 2.0, %v77_v25  ;;  %v80_v33 = vmul.f32 2.0, %v78_v29  ;;  %s171_s0 = smov [#allocation6]   ;;  %s91_s21 = sshll.u32 %s204_s2, 4  ;;  %s92_s21 = int_to_ptr.hbm [resolvable:$true] %s91_s21 }
   0x8   :  { %v31_v1 = vshrl.u32 %v30_v0, 7  ;;  %v34_v2 = vand.u32 127, %v30_v0  ;;  %v46_v7 = vstv %s45_s18  ;;  %s89_s1 = sshll.u32 %s171_s0, 4  ;;  %s90_s1 = int_to_ptr.vmem [resolvable:$true] %s89_s1 }
   0xa   :  { %v35_v3 = vmul.u32 128, %v31_v1  ;;  %v32_v4 = vadd.s32 8, %v31_v1 }
   0xc   :  { %v40_v5 = vadd.s32 %v35_v3, %v34_v2  ;;  %v36_v6 = vmul.u32 128, %v32_v4 }
   0xe   :  { %v43_v8 = vmul.u32 2654435769, %v40_v5  ;;  %v41_v9 = vadd.s32 %v36_v6, %v34_v2 }
  0x10   :  { %v47_v10 = vadd.s32 %v46_v7, %v43_v8  ;;  %v44_v11 = vmul.u32 2654435769, %v41_v9 }
  0x12   :  { %v104_v12 = vshrl.u32 %v47_v10, 16  ;;  %v48_v13 = vadd.s32 %v46_v7, %v44_v11 }
  0x14   :  { %v53_v14 = vxor.u32 %v104_v12, %v47_v10  ;;  %v105_v15 = vshrl.u32 %v48_v13, 16 }
  0x16   :  { %v55_v16 = vmul.u32 2146121005, %v53_v14  ;;  %v54_v17 = vxor.u32 %v105_v15, %v48_v13 }
  0x18   :  { %v106_v18 = vshrl.u32 %v55_v16, 15  ;;  %v56_v19 = vmul.u32 2146121005, %v54_v17 }
  0x1a   :  { %v61_v20 = vxor.u32 %v106_v18, %v55_v16  ;;  %v107_v21 = vshrl.u32 %v56_v19, 15 }
  0x1c   :  { %v63_v22 = vmul.u32 2221713035, %v61_v20  ;;  %v62_v23 = vxor.u32 %v107_v21, %v56_v19 }
  0x1e   :  { %v108_v24 = vshrl.u32 %v63_v22, 16  ;;  %v64_v26 = vmul.u32 2221713035, %v62_v23 }
  0x20   :  { %v69_v27 = vxor.u32 %v108_v24, %v63_v22  ;;  %v109_v28 = vshrl.u32 %v64_v26, 16 }
  0x22   :  { %v110_v31 = vshrl.u32 %v69_v27, 8  ;;  %v70_v32 = vxor.u32 %v109_v28, %v64_v26 }
  0x24   :  { %vm75_vm0 = vcmp.ge.s32.totalorder %v110_v31, 8388608  ;;  %v111_v34 = vshrl.u32 %v70_v32, 8 }
  0x25   :  { %v81_v35 = vsel %vm75_vm0, %v79_v30, 0.0 }
  0x26   :  { %83 = vst [vmem:[#allocation6] sm:$0xff] %v81_v35  ;;  %vm76_vm1 = vcmp.ge.s32.totalorder %v111_v34, 8388608 }
  0x27   :  { %v82_v36 = vsel %vm76_vm1, %v80_v33, 0.0 }
  0x28   :  { %84 = vst [vmem:[#allocation6 + $0x8] sm:$0xff] %v82_v36 }
  0x29   :  { %97 = dma.vmem_to_hbm [thread:$0]  %s90_s1, 256, %s92_s21, [#allocation5], %s169_s14, %s169_s14, %s170_s15  }
  0x2a   :  { %166 = dma.done.wait [#allocation5], 256  }
  0x2b   :  { %167 = vsyncadd [#allocation5], 4294967040 }
  0x2c   :  { %102 = vsyncpa [#allocation4], 1 }
  0x2d   :  { %103 = vsyncpa [#allocation5], 1 }

</bundles_post_ra>
